<compile_context>
chip_gen: v6e
topology: v6e:2x2x1
jax: 0.10.0
libtpu: 0.0.40
codegen_flags: <defaults>
</compile_context>

<pallas_src>
import functools

import jax
import jax.numpy as jnp
import numpy as np
from jax.experimental import pallas as pl
from jax.experimental.pallas import tpu as pltpu


# ------------------------------ fused kernel --------------------------------

def _fused_kernel(x_ref, lab_ref, w_ref, b_ref, emb_ref,
                  logits_ref, emb_out_ref):
    # --- out_fc: logits = x @ W + b (bf16 operands, f32 accumulation) ---
    x = x_ref[...].astype(jnp.bfloat16)            # (tm, E)
    w = w_ref[...].astype(jnp.bfloat16)            # (E, O)
    logits = jnp.dot(x, w, preferred_element_type=jnp.float32)
    logits = logits + b_ref[...].astype(jnp.float32)
    logits_ref[...] = logits.astype(logits_ref.dtype)
    # TODO(synk): output_dim < 128 makes the logits store inherently
    # lane-masked; that is intrinsic to the module's tiny head.

    # --- label_embed: gather rows via exact one-hot matmul on the MXU ---
    tm = lab_ref.shape[0]
    n_labels = emb_ref.shape[0]
    lab = lab_ref[...]                             # (tm, 1) int32
    iota = jax.lax.broadcasted_iota(jnp.int32, (tm, n_labels), 1)
    onehot = (lab == iota).astype(jnp.float32)     # exactly one 1.0 per row
    emb = jnp.dot(onehot, emb_ref[...].astype(jnp.float32),
                  preferred_element_type=jnp.float32)   # exact: 1.0*x + 0.0*...
    emb_out_ref[...] = emb.astype(emb_out_ref.dtype)


# ------------------------------ python wrapper -------------------------------

def context_label_embed_forward(context_features, labels, params, *, block_m=8):
    """Fused forward. Weights use the [in, out] (= W^T of torch Linear) layout."""
    B, E = context_features.shape
    O = params["out_fc_w"].shape[1]
    block_m = min(block_m, B)
    assert B % block_m == 0, "batch must be a multiple of block_m"

    lab2d = labels.astype(jnp.int32).reshape(B, 1)
    b2d = params["out_fc_b"].reshape(1, O)

    cost = pl.CostEstimate(
        flops=2 * B * E * O + 2 * B * O * E,
        transcendentals=0,
        bytes_accessed=4 * (B * E + B + E * O + O + O * E + B * O + B * E),
    )

    out_logits, out_embeddings = pl.pallas_call(
        _fused_kernel,
        out_shape=(
            jax.ShapeDtypeStruct((B, O), context_features.dtype),
            jax.ShapeDtypeStruct((B, E), params["label_embed_w"].dtype),
        ),
        grid=(B // block_m,),
        in_specs=[
            pl.BlockSpec((block_m, E), lambda i: (i, 0)),   # context features
            pl.BlockSpec((block_m, 1), lambda i: (i, 0)),   # labels
            pl.BlockSpec((E, O), lambda i: (0, 0)),         # out_fc weight
            pl.BlockSpec((1, O), lambda i: (0, 0)),         # out_fc bias
            pl.BlockSpec((O, E), lambda i: (0, 0)),         # label_embed weight
        ],
        out_specs=(
            pl.BlockSpec((block_m, O), lambda i: (i, 0)),   # logits
            pl.BlockSpec((block_m, E), lambda i: (i, 0)),   # embeddings
        ),
        compiler_params=pltpu.CompilerParams(
            dimension_semantics=("parallel",)),
        cost_estimate=cost,
    )(context_features, lab2d, params["out_fc_w"], b2d, params["label_embed_w"])

    out_features = context_features                  # pass-through (no copy)
    return out_features, out_logits, out_embeddings, params["label_embed_w"]


# ---------------------------------- main -------------------------------------

if __name__ == "__main__":
    EMBED_DIM = 128     # lane-dense hidden size
    OUTPUT_DIM = 8      # number of labels
    BATCH = 16

    root = jax.random.PRNGKey(0)
    k_ctx, k_lab, k_w, k_emb = jax.random.split(root, 4)

    params = dict(
        # stored as [in, out]; a torch checkpoint's Linear weight would be transposed
        out_fc_w=0.02 * jax.random.normal(k_w, (EMBED_DIM, OUTPUT_DIM), jnp.float32),
        out_fc_b=jnp.zeros((OUTPUT_DIM,), jnp.float32),
        label_embed_w=jax.random.normal(k_emb, (OUTPUT_DIM, EMBED_DIM), jnp.float32),
    )

    context_features = jax.random.normal(k_ctx, (BATCH, EMBED_DIM), jnp.float32)
    labels = jax.random.randint(k_lab, (BATCH,), 0, OUTPUT_DIM, dtype=jnp.int32)

    fwd = jax.jit(functools.partial(context_label_embed_forward, params=params))
    out_features, out_logits, out_embeddings, emb_weight = jax.block_until_ready(
        fwd(context_features, labels))

    # shape checks
    assert out_features.shape == (BATCH, EMBED_DIM)
    assert out_logits.shape == (BATCH, OUTPUT_DIM)
    assert out_embeddings.shape == (BATCH, EMBED_DIM)
    assert emb_weight.shape == (OUTPUT_DIM, EMBED_DIM)

    # correctness vs pure-JAX reference
    ref_logits = context_features @ params["out_fc_w"] + params["out_fc_b"]
    ref_emb = params["label_embed_w"][labels]
    np.testing.assert_allclose(np.asarray(out_features),
                               np.asarray(context_features), rtol=0, atol=0)
    np.testing.assert_allclose(np.asarray(out_logits), np.asarray(ref_logits),
                               rtol=2e-2, atol=2e-2)   # bf16 matmul operands
    np.testing.assert_allclose(np.asarray(out_embeddings), np.asarray(ref_emb),
                               rtol=1e-6, atol=1e-6)   # exact one-hot gather
    np.testing.assert_allclose(np.asarray(emb_weight),
                               np.asarray(params["label_embed_w"]), rtol=0, atol=0)
    assert jnp.all(jnp.isfinite(out_logits)) and jnp.all(jnp.isfinite(out_embeddings))

    print("KERNEL_OK")
</pallas_src>

<mosaic_0001>
module attributes {stable_mosaic.version = 11 : i64} {
  func.func @_fused_kernel(%arg0: i32, %arg1: memref<8x128xf32, #tpu.memory_space<vmem>>, %arg2: memref<8x1xi32, #tpu.memory_space<vmem>>, %arg3: memref<128x8xf32, #tpu.memory_space<vmem>>, %arg4: memref<1x8xf32, #tpu.memory_space<vmem>>, %arg5: memref<8x128xf32, #tpu.memory_space<vmem>>, %arg6: memref<8x8xf32, #tpu.memory_space<vmem>>, %arg7: memref<8x128xf32, #tpu.memory_space<vmem>>) attributes {dimension_semantics = [#tpu.dimension_semantics<parallel>], iteration_bounds = array<i64: 2>, scalar_prefetch = 0 : i64, scratch_operands = 0 : i64, tpu.core_type = #tpu.core_type<tc>, window_params = [{transform_indices = @transform_0, window_bounds = array<i64: 8, 128>}, {transform_indices = @transform_1, window_bounds = array<i64: 8, 1>}, {pipeline_mode = #tpu.pipeline_mode<synchronous>, transform_indices = @transform_2, window_bounds = array<i64: 128, 8>}, {pipeline_mode = #tpu.pipeline_mode<synchronous>, transform_indices = @transform_3, window_bounds = array<i64: 1, 8>}, {pipeline_mode = #tpu.pipeline_mode<synchronous>, transform_indices = @transform_4, window_bounds = array<i64: 8, 128>}, {transform_indices = @transform_5, window_bounds = array<i64: 8, 8>}, {transform_indices = @transform_6, window_bounds = array<i64: 8, 128>}]} {
    %c0 = arith.constant 0 : index
    %c0_0 = arith.constant 0 : index
    %0 = vector.load %arg1[%c0, %c0_0] : memref<8x128xf32, #tpu.memory_space<vmem>>, vector<8x128xf32>
    %1 = arith.truncf %0 : vector<8x128xf32> to vector<8x128xbf16>
    %c0_1 = arith.constant 0 : index
    %c0_2 = arith.constant 0 : index
    %2 = vector.load %arg3[%c0_1, %c0_2] : memref<128x8xf32, #tpu.memory_space<vmem>>, vector<128x8xf32>
    %3 = arith.truncf %2 : vector<128x8xf32> to vector<128x8xbf16>
    %cst = arith.constant dense<0.000000e+00> : vector<8x8xf32>
    %4 = tpu.matmul %1, %3, %cst {dimension_numbers = #tpu.dot_dimension_numbers<[1], [0], [0], [1], [0, 0, 1, 1], [], []>} : vector<8x128xbf16>, vector<128x8xbf16>, vector<8x8xf32> -> vector<8x8xf32>
    %c0_3 = arith.constant 0 : index
    %c0_4 = arith.constant 0 : index
    %5 = vector.load %arg4[%c0_3, %c0_4] : memref<1x8xf32, #tpu.memory_space<vmem>>, vector<1x8xf32>
    %6 = vector.broadcast %5 : vector<1x8xf32> to vector<8x8xf32>
    %7 = arith.addf %4, %6 : vector<8x8xf32>
    %c0_5 = arith.constant 0 : index
    %c0_6 = arith.constant 0 : index
    %8 = vector.load %arg6[%c0_5, %c0_6] : memref<8x8xf32, #tpu.memory_space<vmem>>, vector<8x8xf32>
    tpu.vector_store %arg6[%c0_5, %c0_6], %7 {strides = array<i32>} : memref<8x8xf32, #tpu.memory_space<vmem>>, vector<8x8xf32>,
    %c0_7 = arith.constant 0 : index
    %c0_8 = arith.constant 0 : index
    %9 = vector.load %arg2[%c0_7, %c0_8] : memref<8x1xi32, #tpu.memory_space<vmem>>, vector<8x1xi32>
    %10 = tpu.iota {dimensions = array<i32: 1>} : vector<8x8xi32>
    %11 = vector.broadcast %9 : vector<8x1xi32> to vector<8x8xi32>
    %12 = arith.cmpi eq, %11, %10 : vector<8x8xi32>
    %13 = arith.extui %12 : vector<8x8xi1> to vector<8x8xi32>
    %14 = arith.sitofp %13 : vector<8x8xi32> to vector<8x8xf32>
    %c0_9 = arith.constant 0 : index
    %c0_10 = arith.constant 0 : index
    %15 = vector.load %arg5[%c0_9, %c0_10] : memref<8x128xf32, #tpu.memory_space<vmem>>, vector<8x128xf32>
    %cst_11 = arith.constant dense<0.000000e+00> : vector<8x128xf32>
    %16 = tpu.matmul %14, %15, %cst_11 {dimension_numbers = #tpu.dot_dimension_numbers<[1], [0], [0], [1], [0, 0, 1, 1], [], []>} : vector<8x8xf32>, vector<8x128xf32>, vector<8x128xf32> -> vector<8x128xf32>
    %c0_12 = arith.constant 0 : index
    %c0_13 = arith.constant 0 : index
    %17 = vector.load %arg7[%c0_12, %c0_13] : memref<8x128xf32, #tpu.memory_space<vmem>>, vector<8x128xf32>
    tpu.vector_store %arg7[%c0_12, %c0_13], %16 {strides = array<i32>} : memref<8x128xf32, #tpu.memory_space<vmem>>, vector<8x128xf32>,
    return
  }
  func.func @transform_0(%arg0: i32) -> (i32, i32) {
    %c0_i32 = arith.constant 0 : i32
    %c0_i32_0 = arith.constant 0 : i32
    return %arg0, %c0_i32 : i32, i32
  }
  func.func @transform_1(%arg0: i32) -> (i32, i32) {
    %c0_i32 = arith.constant 0 : i32
    %c0_i32_0 = arith.constant 0 : i32
    return %arg0, %c0_i32 : i32, i32
  }
  func.func @transform_2(%arg0: i32) -> (i32, i32) {
    %c0_i32 = arith.constant 0 : i32
    %c0_i32_0 = arith.constant 0 : i32
    %c0_i32_1 = arith.constant 0 : i32
    return %c0_i32, %c0_i32_0 : i32, i32
  }
  func.func @transform_3(%arg0: i32) -> (i32, i32) {
    %c0_i32 = arith.constant 0 : i32
    %c0_i32_0 = arith.constant 0 : i32
    %c0_i32_1 = arith.constant 0 : i32
    return %c0_i32, %c0_i32_0 : i32, i32
  }
  func.func @transform_4(%arg0: i32) -> (i32, i32) {
    %c0_i32 = arith.constant 0 : i32
    %c0_i32_0 = arith.constant 0 : i32
    %c0_i32_1 = arith.constant 0 : i32
    return %c0_i32, %c0_i32_0 : i32, i32
  }
  func.func @transform_5(%arg0: i32) -> (i32, i32) {
    %c0_i32 = arith.constant 0 : i32
    %c0_i32_0 = arith.constant 0 : i32
    return %arg0, %c0_i32 : i32, i32
  }
  func.func @transform_6(%arg0: i32) -> (i32, i32) {
    %c0_i32 = arith.constant 0 : i32
    %c0_i32_0 = arith.constant 0 : i32
    return %arg0, %c0_i32 : i32, i32
  }
}

</mosaic_0001>

<bundles_post_ra>
// kernel: context_label_embed_forward.1
= control target key start
LH: loop header
LB: loop body
LE: loop exit
PB: predicated region body
PF: predicated region fallthrough
CT: control target
= control target key end

     0   :  { %12 = vsyncpa [#allocation3], 0  ;;  %s955_s0 = inlined_call_operand.vmem [shape: f32[16,128], index: 0, kind: input, shape index: {}]   ;;  %s956_s1 = inlined_call_operand.vmem [shape: s32[16,1], index: 1, kind: input, shape index: {}]   ;;  %s957_s2 = inlined_call_operand.hbm [shape: f32[128,8], index: 2, kind: input, shape index: {}]   ;;  %s958_s3 = inlined_call_operand.vmem [shape: f32[1,8], index: 3, kind: input, shape index: {}]   ;;  %s959_s4 = inlined_call_operand.vmem [shape: f32[8,128], index: 4, kind: input, shape index: {}]   ;;  %s960_s5 = inlined_call_operand.vmem [shape: f32[16,8], index: 5, kind: output, shape index: {0}]   ;;  %s961_s6 = inlined_call_operand.hbm [shape: f32[16,128], index: 6, kind: output, shape index: {1}]  }
   0x1   :  { %13 = vsyncpa [#allocation4], 0 }
   0x2   :  { %15 = vsyncpa [#allocation4 + $0x1], 0  ;;  %s821_s21 = smov 0   ;;  %s823_s22 = smov 0  }
   0x3   :  { %s825_s23 = smov 0   ;;  %s827_s24 = smov 0  }
   0x4 LB: > { %s842_s25 = sadd.s32 4294967295, %s777_s24   ;;  %s578_s26 = sadd.s32 4294967294, %s777_s24   ;;  %s777_s24 = sphi %s827_s24, %s969_s24   ;;  %s773_s23 = sphi %s825_s23, %s968_s23   ;;  %s769_s22 = sphi %s823_s22, %s967_s22   ;;  %s765_s21 = sphi %s821_s21, %s966_s21  }
   0x5   : > { %s846_s27 = sadd.s32 1, %s777_s24   ;;  %s169_s28 = sadd.s32 1, %s773_s23 }
   0x6   : > { %s166_s29 = ssub.s32 %s777_s24, %s846_s27  ;;  %p179_p0 = scmp.ne.s32.totalorder %s773_s23, %s769_s22 }
   0x7   : > { %p167_p1 = scmp.eq.s32.totalorder %s166_s29, 0  ;;  %p180_p2 = scmp.eq.s32.totalorder %s842_s25, 1 }
   0x8   : > { %p185_p3 = scmp.ne.s32.totalorder %s769_s22, %s765_s21  ;;  %p186_p4 = scmp.eq.s32.totalorder %s578_s26, 1 }
   0x9   : > { %s857_s30 = scalar_select %p167_p1, %s773_s23, %s169_s28  }
   0xa   : > { %p859_p5 = por %p180_p2, %p179_p0  ;;  %p863_p6 = por %p186_p4, %p185_p3 }
   0xb   : > { %p579_p7 = scmp.ge.s32.totalorder %s777_s24, 1  ;;  %p193_p8 = scmp.lt.s32.totalorder %s777_s24, 3 }
   0xc   : > { %s963_s8 = scalar_select %p863_p6, 1, 0 }
   0xd   : > { %p645_p9 = scmp.eq.s32.totalorder %s842_s25, 0  ;;  %p870_p10 = pnand %p579_p7, %p193_p8 }
   0xe   : > { %s779_s10 = smov [#allocation2]  }
   0xf   : > { %s205_s11 = sshll.u32 %s779_s10, 4  ;;  %p637_p11 = pneg %p870_p10  ;;  %s206_s11 = int_to_ptr.vmem [resolvable:$true] %s205_s11 }
  0x10   : > { %s698_s12 = scalar_lea.vmem %s206_s11, 2048  ;;  %p706_p3 = scmp.lt.s32.totalorder %s206_s11, %s206_s11 }
  0x11   : > { %p638_p12 = pnand %p645_p9, %p637_p11  ;;  %p699_p0 = scmp.ne.s32.totalorder %s206_s11, %s698_s12 }
  0x12   : > { %p707_p4 = scmp.lt.s32.totalorder %s698_s12, %s698_s12 }
  0x13   : > { %p689_p13 = pneg %p638_p12 }
  0x14   : > { %p708_p6 = por %p707_p4, %p706_p3 }
  0x15   : > { %p701_p1 = pnand %p699_p0, %p689_p13 }
  0x17   : > { %p702_p2 = pneg %p701_p1 }
  0x19   : > { %p709_p7 = pnand %p708_p6, %p702_p2 }
  0x1b   : > { %712 = shalt.err (!%p709_p7)
}
  0x1c   : > { %s780_s13 = smov 128   ;;  %s781_s14 = smov 8  }
  0x1d   : > { %640 = dma.hbm_to_vmem [thread:$0]  (!%p638_p12), %s957_s2, 2048, %s206_s11, [#allocation3], %s780_s13, %s780_s13, %s781_s14  }
  0x1e   : > { %241 = sbr.rel (%p870_p10) target bundleno = 376 (0x178), region = 40 }
  0x23   : > { %756 = dma.done.wait (%p645_p9), [#allocation3], 2048  }
  0x24   : > { %758 = vsyncadd (%p645_p9), [#allocation3], 4294965248  ;;  %p278_p8 = scmp.lt.s32.totalorder %s842_s25, 1  ;;  %v782_v0 = vmov 0   ;;  %v783_v1 = vmov 0.0   ;;  %vm784_vm0 = vmmov 0   ;;  %v367_v30 = vlaneseq }
  0x25   : > { %686 = vset.pattern.permute.xlu0 %v782_v0  ;;  %606 = vmatprep.subr.bf16.mxu0 %v783_v1  ;;  %v307_v3 = vld [vmem:[#allocation2 + $0x70] sm:$0xff]  ;;  %v308_v4 = vld [vmem:[#allocation2 + $0x78] sm:$0xff]  ;;  %v305_v6 = vld [vmem:[#allocation2 + $0x60] sm:$0xff]  ;;  %vm364_vm1 = vcmask 64512   ;;  %s592_s28 = sshll.u32 %s842_s25, 7 }
  0x26   : > { %s279_s17 = scalar_select %p278_p8, %s842_s25, 1  ;;  %622 = vmatprep.mubr.msk.bf16.mxu0 %vm784_vm0, %v783_v1  ;;  %626 = vmatprep.subr.mxu1 %v783_v1  ;;  %v316_v5 = vpack.c.bf16 %v308_v4, %v307_v3  ;;  %v306_v7 = vld [vmem:[#allocation2 + $0x68] sm:$0xff]  ;;  %v303_v9 = vld [vmem:[#allocation2 + $0x50] sm:$0xff]  ;;  %v304_v10 = vld [vmem:[#allocation2 + $0x58] sm:$0xff]  ;;  %v368_v31 = vand.u32 127, %v367_v30 }
  0x27   : > { %628 = vmatprep.mubr.msk.f32.mxu1 %vm784_vm0, %v783_v1  ;;  %v315_v8 = vpack.c.bf16 %v306_v7, %v305_v6  ;;  %v375_v11 = vld [vmem:[%s959_s4] sm:$0xff]  ;;  %v314_v12 = vpack.c.bf16 %v304_v10, %v303_v9  ;;  %v302_v14 = vld [vmem:[#allocation2 + $0x48] sm:$0xff]  ;;  %v299_v16 = vld [vmem:[#allocation2 + $0x30] sm:$0xff]  ;;  %s785_s25 = smov [#allocation5]  }
  0x28   : > { %s889_s18 = sshll.u32 %s279_s17, 3  ;;  %607 = vmatpush3.bf16.msra.mxu0 %v316_v5  ;;  %627 = vmatpush3.msra.mxu1 %v375_v11  ;;  %v301_v13 = vld [vmem:[#allocation2 + $0x40] sm:$0xff]  ;;  %v300_v17 = vld [vmem:[#allocation2 + $0x38] sm:$0xff]  ;;  %v298_v20 = vld [vmem:[#allocation2 + $0x28] sm:$0xff]  ;;  %s275_s17 = sand.u32 1, %s769_s22  }
  0x29   : > { %s285_s26 = scalar_lea.vmem %s956_s1, %s889_s18  ;;  %608 = vmatprep.subr.bf16.mxu0 %v783_v1  ;;  %v313_v15 = vpack.c.bf16 %v302_v14, %v301_v13  ;;  %v312_v18 = vpack.c.bf16 %v300_v17, %v299_v16  ;;  %v297_v19 = vld [vmem:[#allocation2 + $0x20] sm:$0xff]  ;;  %v295_v22 = vld [vmem:[#allocation2 + $0x10] sm:$0xff]  ;;  %v296_v23 = vld [vmem:[#allocation2 + $0x18] sm:$0xff]  ;;  %s281_s11 = scalar_lea.vmem %s955_s0, %s889_s18 }
  0x2a   : > { %v366_v2 = vld [vmem:[%s285_s26] sm:$0xff]  ;;  %v311_v21 = vpack.c.bf16 %v298_v20, %v297_v19  ;;  %v310_v24 = vpack.c.bf16 %v296_v23, %v295_v22  ;;  %v294_v26 = vld [vmem:[#allocation2 + $0x8] sm:$0xff]  ;;  %s289_s16 = scalar_lea.vmem %s960_s5, %s889_s18  ;;  %s584_s19 = sshll.u32 %s275_s17, 3 }
  0x2b   : > { %370 = vperm.xlu0 %686, %v366_v2   ;;  %v293_v25 = vld [vmem:[#allocation2] sm:$0xff]  ;;  %s277_s20 = scalar_lea.vmem [#allocation5], %s584_s19  ;;  %s916_s18 = scalar_lea.hbm %s961_s6, %s592_s28 }
  0x2c   : > { %609 = vmatpush3.bf16.msra.mxu0 %v315_v8  ;;  %v309_v27 = vpack.c.bf16 %v294_v26, %v293_v25  ;;  %v291_v28 = vld [vmem:[%s281_s11] sm:$0xff]  ;;  %s471_s26 = sshll.u32 %s277_s20, 4  ;;  %s455_s10 = scalar_lea.sflag [#allocation4], %s275_s17  ;;  %s911_s26 = int_to_ptr.vmem [resolvable:$true] %s471_s26 }
  0x2d   : > { %610 = vmatprep.subr.bf16.mxu0 %v783_v1  ;;  %v292_v29 = vpack.c.bf16 %v291_v28, %v291_v28  ;;  %v588_v34 = vld [vmem:[%s958_s3] ss:$0 sm:$0xff]  ;;  %s713_s11 = scalar_lea.vmem %s911_s26, 128  ;;  %s717_s12 = sshll.u32 %s785_s25, 4  ;;  %s718_s12 = int_to_ptr.vmem [resolvable:$false] %s717_s12 }
  0x2e   : > { %p714_p6 = scmp.ne.s32.totalorder %s911_s26, %s713_s11  ;;  %s719_s13 = scalar_lea.vmem %s718_s12, 256 }
  0x2f   : > { %p720_p11 = scmp.lt.s32.totalorder %s911_s26, %s718_s12  ;;  %p721_p12 = scmp.lt.s32.totalorder %s719_s13, %s713_s11 }
  0x30   : > { %611 = vmatpush3.bf16.msra.mxu0 %v314_v12  ;;  %p715_p9 = pnand %p714_p6, %p859_p5 }
  0x31   : > { %612 = vmatprep.subr.bf16.mxu0 %v783_v1  ;;  %p722_p13 = por %p721_p12, %p720_p11 }
  0x32   : > { %p716_p10 = pneg %p715_p9 }
  0x34   : > { %613 = vmatpush3.bf16.msra.mxu0 %v313_v15  ;;  %p723_p0 = pnand %p722_p13, %p716_p10 }
  0x35   : > { %614 = vmatprep.subr.bf16.mxu0 %v783_v1 }
  0x38   : > { %615 = vmatpush3.bf16.msra.mxu0 %v312_v18 }
  0x39   : > { %616 = vmatprep.subr.bf16.mxu0 %v783_v1 }
  0x3c   : > { %617 = vmatpush3.bf16.msra.mxu0 %v311_v21 }
  0x3d   : > { %618 = vmatprep.subr.bf16.mxu0 %v783_v1 }
  0x40   : > { %619 = vmatpush3.bf16.msra.mxu0 %v310_v24 }
  0x41   : > { %620 = vmatprep.subr.bf16.mxu0 %v783_v1 }
  0x44   : > { %621 = vmatpush3.bf16.msra.mxu0 %v309_v27 }
  0x47   : > { %623 = vmatmul.mubr.bf16.vlgmr.msra.gmra.mxu0 %v292_v29 }
  0xa6   : > { %v371_v32 = vpop.permute.xlu0 %370 }
  0xa7   : > { %vm372_vm2 = vcmp.eq.s32.totalorder %v371_v32, %v368_v31 }
  0xa8   : > { %v589_v33 = vsel %vm372_vm2, 1.0, %v783_v1 }
  0xa9   : > { %629 = vmatmul.mubr.msk.f32.vlgmr.msra.gmra.mxu1 %vm364_vm1, %v589_v33 }
 0x107   : > { %v358_v35 = vpop.f32.mrf.mxu0 }
 0x108   : > { %v359_v36 = vadd.f32 %v588_v34, %v358_v35 }
 0x109   : > { %v624_v37 = vpop.f32.mrf.mxu0 }
 0x10a   : > { %365 = vst.msk [vmem:[%s289_s16] sm:$0xff] %vm364_vm1, %v359_v36 }
 0x10b   : > { %v361_v38 = vpop.f32.mrf.mxu0 }
 0x10d   : > { %v625_v39 = vpop.f32.mrf.mxu0 }
 0x169   : > { %v445_v40 = vpop.f32.mrf.mxu1 }
 0x16a   : > { %449 = vst [vmem:[%s277_s20] sm:$0xff] %v445_v40 }
 0x16b   : > { %v630_v41 = vpop.f32.mrf.mxu1 }
 0x16c   : > { %726 = shalt.err (!%p723_p0)
}
 0x16d   : > { %s727_s14 = scalar_lea.hbm %s916_s18, 128  ;;  %s731_s17 = scalar_lea.hbm %s961_s6, 256 }
 0x16e   : > { %p728_p1 = scmp.ne.s32.totalorder %s916_s18, %s727_s14  ;;  %p732_p4 = scmp.lt.s32.totalorder %s916_s18, %s961_s6 }
 0x16f   : > { %p733_p7 = scmp.lt.s32.totalorder %s731_s17, %s727_s14 }
 0x170   : > { %p729_p2 = pnand %p728_p1, %p859_p5 }
 0x171   : > { %p734_p8 = por %p733_p7, %p732_p4 }
 0x172   : > { %p730_p3 = pneg %p729_p2 }
 0x174   : > { %p735_p6 = pnand %p734_p8, %p730_p3 }
 0x176   : > { %738 = shalt.err (!%p735_p6)
}
 0x177   : > { %635 = dma.vmem_to_hbm [thread:$0]  (%p859_p5), %s911_s26, 128, %s916_s18, %s455_s10  }
 0x178 PF: > { %p647_p9 = scmp.ge.s32.totalorder %s777_s24, 2  ;;  %s490_s28 = sand.u32 1, %s765_s21  }
 0x179   : > { %p965_p10 = scmp.ne.s32.totalorder %s963_s8, 0  ;;  %s491_s29 = scalar_lea.sflag [#allocation4], %s490_s28 }
 0x17b   : > { %p642_p11 = pnand %p647_p9, %p965_p10 }
 0x17d   : > { %p643_p12 = pneg %p642_p11 }
 0x17f   : > { %760 = dma.done.wait (%p643_p12), %s491_s29, 128  }
 0x180   : > { %762 = vsyncadd (%p643_p12), %s491_s29, 4294967168  ;;  %p18_p13 = scmp.ge.s32.totalorder %s846_s27, 4   ;;  %s966_s21 = smov %s769_s22 }
 0x181   : > { %s967_s22 = smov %s773_s23  ;;  %s968_s23 = smov %s857_s30 }
 0x182   : > { %s969_s24 = smov %s846_s27  ;;  %20 = sbr.rel (!%p18_p13) target bundleno = 4 (0x4), region = 95 }
 0x187   :  { %496 = vsyncpa [#allocation3], 1 }
 0x188   :  { %498 = vsyncpa [#allocation3 + $0x1], 1 }
 0x189   :  { %499 = vsyncpa [#allocation4], 1 }
 0x18a   :  { %501 = vsyncpa [#allocation4 + $0x1], 1 }

</bundles_post_ra>
